<compile_context>
chip_gen: v7x
topology: tpu7x:2x2x1
jax: 0.10.0
libtpu: 0.0.40
codegen_flags: <defaults>
</compile_context>

<pallas_src>
import functools

import jax
import jax.numpy as jnp
from jax import lax
from jax.experimental import pallas as pl
from jax.experimental.pallas import tpu as pltpu


def _focal_loss_kernel(x_ref, t_ref, sum_out_ref, cnt_out_ref, acc,
                       *, gamma, ignore_index, hw_valid, n_images,
                       tiles_per_split, need_pix_mask, need_batch_mask):
    j = pl.program_id(2)
    n_j = pl.num_programs(2)

    @pl.when(j == 0)
    def _():
        acc[...] = jnp.zeros_like(acc)

    x = x_ref[...].astype(jnp.float32)        # (Nb, C, TP): classes on sublanes
    t = t_ref[...]                            # (Nb, 1, TP) int32 targets
    nb, c, tp = x.shape

    # Valid-pixel mask; ragged-pixel / ragged-batch masks only when statically needed.
    valid = t != ignore_index                 # (Nb, 1, TP) bool
    if need_pix_mask:
        gj = pl.program_id(0) * tiles_per_split + j
        lane = lax.broadcasted_iota(jnp.int32, (nb, 1, tp), 2)
        valid = valid & ((gj * tp + lane) < hw_valid)
    if need_batch_mask:
        brow = lax.broadcasted_iota(jnp.int32, (nb, 1, tp), 0)
        valid = valid & ((pl.program_id(1) * nb + brow) < n_images)

    # Numerically stable log-softmax pieces along the class (sublane) axis.
    m = jnp.max(x, axis=1, keepdims=True)               # (Nb, 1, TP)
    z = x - m                                           # (Nb, C, TP)
    se = jnp.sum(jnp.exp(z), axis=1, keepdims=True)     # (Nb, 1, TP)
    logse = jnp.log(se)

    # Gather z at the target class via a one-hot select over the (small) class axis.
    cls = lax.broadcasted_iota(jnp.int32, (nb, c, tp), 1)
    z_t = jnp.sum(jnp.where(cls == t, z, 0.0), axis=1, keepdims=True)   # (Nb, 1, TP)

    logp_t = z_t - logse                                 # log p_t
    p_t = jnp.exp(logp_t)
    one_minus_p = 1.0 - p_t

    g = float(gamma)
    if g == 0.0:
        focal_t = logp_t
    elif g.is_integer() and 1 <= int(g) <= 8:
        mod = one_minus_p                                # gamma=2 -> one extra multiply
        for _ in range(int(g) - 1):
            mod = mod * one_minus_p
        focal_t = mod * logp_t
    else:
        focal_t = jnp.power(jnp.maximum(one_minus_p, 0.0), g) * logp_t

    # Fused accumulator update: row 0 = focal sum, row 1 = valid-pixel count.
    contrib = jnp.concatenate(
        [jnp.where(valid, focal_t, 0.0), valid.astype(jnp.float32)], axis=1)  # (Nb, 2, TP)
    if nb > 1:
        contrib = jnp.sum(contrib, axis=0)               # (2, TP)
    else:
        contrib = contrib[0]
    acc[...] += contrib

    @pl.when(j == n_j - 1)
    def _():
        sum_out_ref[...] = jnp.sum(acc[0:1, :]).reshape(1, 1, 1, 1)
        cnt_out_ref[...] = jnp.sum(acc[1:2, :]).reshape(1, 1, 1, 1)


def _tpu_vmem_capacity_bytes():
    """Physical per-core VMEM; conservative 64 MiB (v7x) fallback if unknown."""
    default = 64 << 20
    try:
        info = pltpu.get_tpu_info()
    except Exception:
        return default
    for name in ("vmem_capacity_bytes", "vmem_bytes", "vmem_size_bytes"):
        v = getattr(info, name, None)
        if isinstance(v, int) and v > 0:
            return v
    return default


def _round_up(v, m):
    return ((v + m - 1) // m) * m


def focal_loss_2d(inputs_nchw, targets, *, gamma=2.0, ignore_index=255, max_tp=32768):
    """inputs_nchw: (N, C, H, W) float logits; targets: (N, H, W) int class ids."""
    N, C, H, W = inputs_nchw.shape
    HW = H * W
    LANE = 128

    # Free reshapes only — no transpose, no pad of the logits.
    x = inputs_nchw.reshape(N, C, HW)
    t = targets.reshape(N, 1, HW)
    if t.dtype != jnp.int32:
        t = t.astype(jnp.int32)   # skipped for int32 callers (no extra HBM pass)

    # ---- Generation-aware tile selection -------------------------------------
    phys = _tpu_vmem_capacity_bytes()
    budget = int(phys * 0.45)                  # double-buffered inputs + accumulator

    c_pad = _round_up(C, 8)                    # f32 sublane padding of the class axis
    bytes_per_lane_row = 2 * 4 * (c_pad + 8)   # 2 bufs * 4B * (logits + padded targets)
    acc_bytes_per_lane = 32                    # (2, TP) f32 acc padded to 8 sublanes

    tp_cap = budget // (bytes_per_lane_row + acc_bytes_per_lane)
    tp_cap = max(LANE, (tp_cap // LANE) * LANE)
    tp_target = max(LANE, (min(int(max_tp), tp_cap) // LANE) * LANE)

    hw_rounded = _round_up(HW, LANE)
    if hw_rounded >= tp_target:
        tp, nb = tp_target, 1                  # large image: big pixel tile, Nb = 1
    else:
        tp = hw_rounded                        # small image: whole image per tile,
        nb = max(1, min(N, tp_target // tp))   # several images per grid step
        nb = max(1, min(nb, (budget - acc_bytes_per_lane * tp) // (bytes_per_lane_row * tp)))

    n_tiles = pl.cdiv(HW, tp)
    n_bblocks = pl.cdiv(N, nb)

    # Split the pixel axis across 2 cores (v7x megacore) when batch parallelism is 1.
    n_splits = 2 if (n_bblocks == 1 and n_tiles >= 2) else 1
    tiles_per_split = pl.cdiv(n_tiles, n_splits)

    need_pix_mask = (n_splits * tiles_per_split * tp) != HW
    need_batch_mask = (n_bblocks * nb) != N

    est_bytes = nb * tp * bytes_per_lane_row + acc_bytes_per_lane * tp
    vmem_limit = int(min(phys * 0.9, max(2 * est_bytes, 32 << 20)))

    kernel = functools.partial(
        _focal_loss_kernel,
        gamma=float(gamma),
        ignore_index=int(ignore_index),
        hw_valid=int(HW),
        n_images=int(N),
        tiles_per_split=int(tiles_per_split),
        need_pix_mask=need_pix_mask,
        need_batch_mask=need_batch_mask,
    )

    last_tile = n_tiles - 1
    if n_splits * tiles_per_split == n_tiles:
        def in_map(s, b, j):
            return (b, 0, s * tiles_per_split + j)
    else:
        def in_map(s, b, j):
            # Clamp duplicated tail tiles; their pixels are masked out in-kernel.
            return (b, 0, jnp.minimum(s * tiles_per_split + j, last_tile))

    partial_sum, partial_cnt = pl.pallas_call(
        kernel,
        out_shape=(
            jax.ShapeDtypeStruct((n_splits, n_bblocks, 1, 1), jnp.float32),  # focal sums
            jax.ShapeDtypeStruct((n_splits, n_bblocks, 1, 1), jnp.float32),  # valid counts
        ),
        grid_spec=pltpu.PrefetchScalarGridSpec(
            num_scalar_prefetch=0,
            grid=(n_splits, n_bblocks, tiles_per_split),
            in_specs=[
                pl.BlockSpec((nb, C, tp), in_map),   # logits (NCHW view)
                pl.BlockSpec((nb, 1, tp), in_map),   # targets
            ],
            out_specs=(
                pl.BlockSpec((1, 1, 1, 1), lambda s, b, j: (s, b, 0, 0)),
                pl.BlockSpec((1, 1, 1, 1), lambda s, b, j: (s, b, 0, 0)),
            ),
            scratch_shapes=[
                pltpu.VMEM((2, tp), jnp.float32),    # fused lane-wide sum/count acc
            ],
        ),
        compiler_params=pltpu.CompilerParams(
            dimension_semantics=("parallel", "parallel", "arbitrary"),
            vmem_limit_bytes=vmem_limit,
        ),
    )(x, t)

    # Tiny final combine in XLA (matches PyTorch: NaN/Inf if every pixel is ignored).
    return -jnp.sum(partial_sum) / jnp.sum(partial_cnt)


def _focal_loss_ref(inputs_nchw, targets, *, gamma=2.0, ignore_index=255):
    logp = jax.nn.log_softmax(inputs_nchw, axis=1)
    p = jax.nn.softmax(inputs_nchw, axis=1)
    focal = (1.0 - p) ** gamma * logp                      # (N, C, H, W)
    valid = targets != ignore_index
    safe_t = jnp.where(valid, targets, 0)
    picked = jnp.take_along_axis(focal, safe_t[:, None, :, :], axis=1)[:, 0]  # (N, H, W)
    picked = jnp.where(valid, picked, 0.0)
    return -jnp.sum(picked) / jnp.sum(valid.astype(jnp.float32))


if __name__ == "__main__":
    key = jax.random.PRNGKey(0)
    k1, k2, k3 = jax.random.split(key, 3)

    # Primary small-shape check (batch=2, channels=4, spatial=16x16).
    N, C, H, W = 2, 4, 16, 16
    inputs = jax.random.normal(k1, (N, C, H, W), dtype=jnp.float32)
    targets = jax.random.randint(k2, (N, H, W), 0, C, dtype=jnp.int32)
    ignore_mask = jax.random.uniform(k3, (N, H, W)) < 0.1
    targets = jnp.where(ignore_mask, 255, targets)

    loss = jax.block_until_ready(focal_loss_2d(inputs, targets, gamma=2.0, ignore_index=255))
    ref = _focal_loss_ref(inputs, targets, gamma=2.0, ignore_index=255)
    assert jnp.allclose(loss, ref, rtol=1e-5, atol=1e-5), (loss, ref)

    # Ragged spatial extent + multi-image blocking path (HW not a multiple of 128).
    k4, k5, k6 = jax.random.split(jax.random.PRNGKey(0), 3)
    N2, C2, H2, W2 = 3, 5, 10, 13
    inputs2 = jax.random.normal(k4, (N2, C2, H2, W2), dtype=jnp.float32)
    targets2 = jax.random.randint(k5, (N2, H2, W2), 0, C2, dtype=jnp.int32)
    targets2 = jnp.where(jax.random.uniform(k6, (N2, H2, W2)) < 0.1, 255, targets2)

    loss2 = jax.block_until_ready(focal_loss_2d(inputs2, targets2, gamma=2.0, ignore_index=255))
    ref2 = _focal_loss_ref(inputs2, targets2, gamma=2.0, ignore_index=255)
    assert jnp.allclose(loss2, ref2, rtol=1e-5, atol=1e-5), (loss2, ref2)

    print("KERNEL_OK")
</pallas_src>

<mosaic_0001>
module attributes {stable_mosaic.version = 11 : i64} {
  func.func @_focal_loss_kernel(%arg0: i32, %arg1: i32, %arg2: i32, %arg3: memref<2x4x256xf32, #tpu.memory_space<vmem>>, %arg4: memref<2x1x256xi32, #tpu.memory_space<vmem>>, %arg5: memref<1x1x1x1xf32, #tpu.memory_space<vmem>>, %arg6: memref<1x1x1x1xf32, #tpu.memory_space<vmem>>, %arg7: memref<2x256xf32, #tpu.memory_space<vmem>>) attributes {dimension_semantics = [#tpu.dimension_semantics<parallel>, #tpu.dimension_semantics<parallel>, #tpu.dimension_semantics<arbitrary>], iteration_bounds = array<i64: 1, 1, 1>, scalar_prefetch = 0 : i64, scratch_operands = 1 : i64, tpu.core_type = #tpu.core_type<tc>, window_params = [{transform_indices = @transform_0, window_bounds = array<i64: 2, 4, 256>}, {transform_indices = @transform_1, window_bounds = array<i64: 2, 1, 256>}, {transform_indices = @transform_2, window_bounds = array<i64: 1, 1, 1, 1>}, {transform_indices = @transform_3, window_bounds = array<i64: 1, 1, 1, 1>}]} {
    %c0_i32 = arith.constant 0 : i32
    %0 = arith.cmpi eq, %arg2, %c0_i32 : i32
    %1 = arith.extui %0 : i1 to i32
    %c0_i32_0 = arith.constant 0 : i32
    %2 = arith.cmpi ne, %1, %c0_i32_0 : i32
    scf.if %2 {
      %cst_18 = arith.constant 0.000000e+00 : f32
      %40 = vector.broadcast %cst_18 : f32 to vector<2x256xf32>
      %c0_19 = arith.constant 0 : index
      %c0_20 = arith.constant 0 : index
      %41 = vector.load %arg7[%c0_19, %c0_20] : memref<2x256xf32, #tpu.memory_space<vmem>>, vector<2x256xf32>
      tpu.vector_store %arg7[%c0_19, %c0_20], %40 {strides = array<i32>} : memref<2x256xf32, #tpu.memory_space<vmem>>, vector<2x256xf32>,
    } else {
    }
    %c0 = arith.constant 0 : index
    %c0_1 = arith.constant 0 : index
    %c0_2 = arith.constant 0 : index
    %3 = vector.load %arg3[%c0, %c0_1, %c0_2] : memref<2x4x256xf32, #tpu.memory_space<vmem>>, vector<2x4x256xf32>
    %c0_3 = arith.constant 0 : index
    %c0_4 = arith.constant 0 : index
    %c0_5 = arith.constant 0 : index
    %4 = vector.load %arg4[%c0_3, %c0_4, %c0_5] : memref<2x1x256xi32, #tpu.memory_space<vmem>>, vector<2x1x256xi32>
    %c255_i32 = arith.constant 255 : i32
    %5 = vector.broadcast %c255_i32 : i32 to vector<2x1x256xi32>
    %6 = arith.cmpi ne, %4, %5 : vector<2x1x256xi32>
    %cst = arith.constant dense<0xFF800000> : vector<2x256xf32>
    %7 = vector.multi_reduction <maximumf>, %3, %cst [1] : vector<2x4x256xf32> to vector<2x256xf32>
    %8 = vector.shape_cast %7 : vector<2x256xf32> to vector<2x1x256xf32>
    %9 = vector.broadcast %8 : vector<2x1x256xf32> to vector<2x4x256xf32>
    %10 = arith.subf %3, %9 : vector<2x4x256xf32>
    %11 = math.exp %10 : vector<2x4x256xf32>
    %cst_6 = arith.constant dense<0.000000e+00> : vector<2x256xf32>
    %12 = vector.multi_reduction <add>, %11, %cst_6 [1] : vector<2x4x256xf32> to vector<2x256xf32>
    %13 = vector.shape_cast %12 : vector<2x256xf32> to vector<2x1x256xf32>
    %14 = math.log %13 : vector<2x1x256xf32>
    %15 = tpu.iota {dimensions = array<i32: 1>} : vector<2x4x256xi32>
    %16 = vector.broadcast %4 : vector<2x1x256xi32> to vector<2x4x256xi32>
    %17 = arith.cmpi eq, %15, %16 : vector<2x4x256xi32>
    %cst_7 = arith.constant 0.000000e+00 : f32
    %18 = vector.broadcast %cst_7 : f32 to vector<2x4x256xf32>
    %19 = arith.select %17, %10, %18 : vector<2x4x256xi1>, vector<2x4x256xf32>
    %cst_8 = arith.constant dense<0.000000e+00> : vector<2x256xf32>
    %20 = vector.multi_reduction <add>, %19, %cst_8 [1] : vector<2x4x256xf32> to vector<2x256xf32>
    %21 = vector.shape_cast %20 : vector<2x256xf32> to vector<2x1x256xf32>
    %22 = arith.subf %21, %14 : vector<2x1x256xf32>
    %23 = math.exp %22 : vector<2x1x256xf32>
    %cst_9 = arith.constant 1.000000e+00 : f32
    %24 = vector.broadcast %cst_9 : f32 to vector<2x1x256xf32>
    %25 = arith.subf %24, %23 : vector<2x1x256xf32>
    %26 = arith.mulf %25, %25 : vector<2x1x256xf32>
    %27 = arith.mulf %26, %22 : vector<2x1x256xf32>
    %cst_10 = arith.constant 0.000000e+00 : f32
    %28 = vector.broadcast %cst_10 : f32 to vector<2x1x256xf32>
    %29 = arith.select %6, %27, %28 : vector<2x1x256xi1>, vector<2x1x256xf32>
    %30 = arith.extui %6 : vector<2x1x256xi1> to vector<2x1x256xi32>
    %31 = arith.sitofp %30 : vector<2x1x256xi32> to vector<2x1x256xf32>
    %32 = tpu.concatenate %29, %31 in 1 : vector<2x1x256xf32>, vector<2x1x256xf32> -> vector<2x2x256xf32>
    %cst_11 = arith.constant dense<0.000000e+00> : vector<2x256xf32>
    %33 = vector.multi_reduction <add>, %32, %cst_11 [0] : vector<2x2x256xf32> to vector<2x256xf32>
    %c0_12 = arith.constant 0 : index
    %c0_13 = arith.constant 0 : index
    %34 = vector.load %arg7[%c0_12, %c0_13] : memref<2x256xf32, #tpu.memory_space<vmem>>, vector<2x256xf32>
    %35 = arith.addf %34, %33 : vector<2x256xf32>
    %c0_14 = arith.constant 0 : index
    %c0_15 = arith.constant 0 : index
    %36 = vector.load %arg7[%c0_14, %c0_15] : memref<2x256xf32, #tpu.memory_space<vmem>>, vector<2x256xf32>
    tpu.vector_store %arg7[%c0_14, %c0_15], %35 {strides = array<i32>} : memref<2x256xf32, #tpu.memory_space<vmem>>, vector<2x256xf32>,
    %c0_i32_16 = arith.constant 0 : i32
    %37 = arith.cmpi eq, %arg2, %c0_i32_16 : i32
    %38 = arith.extui %37 : i1 to i32
    %c0_i32_17 = arith.constant 0 : i32
    %39 = arith.cmpi ne, %38, %c0_i32_17 : i32
    scf.if %39 {
      %c0_18 = arith.constant 0 : index
      %c0_19 = arith.constant 0 : index
      %40 = vector.load %arg7[%c0_18, %c0_19] : memref<2x256xf32, #tpu.memory_space<vmem>>, vector<1x256xf32>
      %41 = vector.shape_cast %40 : vector<1x256xf32> to vector<1x1x256xf32>
      %cst_20 = arith.constant dense<0.000000e+00> : vector<1xf32>
      %42 = vector.multi_reduction <add>, %41, %cst_20 [1, 2] : vector<1x1x256xf32> to vector<1xf32>
      %43 = vector.shape_cast %42 : vector<1xf32> to vector<1x1x1xf32>
      %44 = vector.extract %43[0, 0, 0] : f32 from vector<1x1x1xf32>
      %45 = vector.broadcast %44 : f32 to vector<1x1x1x1xf32>
      %c0_21 = arith.constant 0 : index
      %c0_22 = arith.constant 0 : index
      %c0_23 = arith.constant 0 : index
      %c0_24 = arith.constant 0 : index
      %46 = vector.load %arg5[%c0_21, %c0_22, %c0_23, %c0_24] : memref<1x1x1x1xf32, #tpu.memory_space<vmem>>, vector<1x1x1x1xf32>
      tpu.vector_store %arg5[%c0_21, %c0_22, %c0_23, %c0_24], %45 {strides = array<i32>} : memref<1x1x1x1xf32, #tpu.memory_space<vmem>>, vector<1x1x1x1xf32>,
      %c1 = arith.constant 1 : index
      %c0_25 = arith.constant 0 : index
      %47 = vector.load %arg7[%c1, %c0_25] : memref<2x256xf32, #tpu.memory_space<vmem>>, vector<1x256xf32>
      %48 = vector.shape_cast %47 : vector<1x256xf32> to vector<1x1x256xf32>
      %cst_26 = arith.constant dense<0.000000e+00> : vector<1xf32>
      %49 = vector.multi_reduction <add>, %48, %cst_26 [1, 2] : vector<1x1x256xf32> to vector<1xf32>
      %50 = vector.shape_cast %49 : vector<1xf32> to vector<1x1x1xf32>
      %51 = vector.extract %50[0, 0, 0] : f32 from vector<1x1x1xf32>
      %52 = vector.broadcast %51 : f32 to vector<1x1x1x1xf32>
      %c0_27 = arith.constant 0 : index
      %c0_28 = arith.constant 0 : index
      %c0_29 = arith.constant 0 : index
      %c0_30 = arith.constant 0 : index
      %53 = vector.load %arg6[%c0_27, %c0_28, %c0_29, %c0_30] : memref<1x1x1x1xf32, #tpu.memory_space<vmem>>, vector<1x1x1x1xf32>
      tpu.vector_store %arg6[%c0_27, %c0_28, %c0_29, %c0_30], %52 {strides = array<i32>} : memref<1x1x1x1xf32, #tpu.memory_space<vmem>>, vector<1x1x1x1xf32>,
    } else {
    }
    return
  }
  func.func @transform_0(%arg0: i32, %arg1: i32, %arg2: i32) -> (i32, i32, i32) {
    %c1_i32 = arith.constant 1 : i32
    %0 = arith.muli %arg0, %c1_i32 : i32
    %1 = arith.addi %0, %arg2 : i32
    %c0_i32 = arith.constant 0 : i32
    %c0_i32_0 = arith.constant 0 : i32
    return %arg1, %c0_i32, %1 : i32, i32, i32
  }
  func.func @transform_1(%arg0: i32, %arg1: i32, %arg2: i32) -> (i32, i32, i32) {
    %c1_i32 = arith.constant 1 : i32
    %0 = arith.muli %arg0, %c1_i32 : i32
    %1 = arith.addi %0, %arg2 : i32
    %c0_i32 = arith.constant 0 : i32
    %c0_i32_0 = arith.constant 0 : i32
    return %arg1, %c0_i32, %1 : i32, i32, i32
  }
  func.func @transform_2(%arg0: i32, %arg1: i32, %arg2: i32) -> (i32, i32, i32, i32) {
    %c0_i32 = arith.constant 0 : i32
    %c0_i32_0 = arith.constant 0 : i32
    %c0_i32_1 = arith.constant 0 : i32
    return %arg0, %arg1, %c0_i32, %c0_i32_0 : i32, i32, i32, i32
  }
  func.func @transform_3(%arg0: i32, %arg1: i32, %arg2: i32) -> (i32, i32, i32, i32) {
    %c0_i32 = arith.constant 0 : i32
    %c0_i32_0 = arith.constant 0 : i32
    %c0_i32_1 = arith.constant 0 : i32
    return %arg0, %arg1, %c0_i32, %c0_i32_0 : i32, i32, i32, i32
  }
}

</mosaic_0001>

<bundles_post_ra>
// kernel: tpu_custom_call.1
= control target key start
LH: loop header
LB: loop body
LE: loop exit
PB: predicated region body
PF: predicated region fallthrough
CT: control target
= control target key end

     0   :  { %9 = vsyncpa [#allocation4], 0  ;;  %s723_s0 = inlined_call_operand.hbm [shape: f32[2,4,256], index: 0, kind: input, shape index: {}]   ;;  %s724_s1 = inlined_call_operand.hbm [shape: s32[2,1,256], index: 1, kind: input, shape index: {}]   ;;  %s725_s2 = inlined_call_operand.hbm [shape: f32[1,1,1,1], index: 2, kind: output, shape index: {0}]   ;;  %s726_s3 = inlined_call_operand.hbm [shape: f32[1,1,1,1], index: 3, kind: output, shape index: {1}]  }
   0x1   :  { %10 = vsyncpa [#allocation7], 0 }
   0x2   :  { %11 = vsyncpa [#allocation5], 0 }
   0x3   :  { %12 = vsyncpa [#allocation10], 0  ;;  %s575_s12 = smov [#allocation3]   ;;  %s479_s16 = scalar_lea.hbm %s723_s0, 256 }
   0x4   :  { %s22_s13 = sshll.u32 %s575_s12, 4  ;;  %p480_p0 = scmp.ne.s32.totalorder %s723_s0, %s479_s16  ;;  %s23_s13 = int_to_ptr.vmem [resolvable:$true] %s22_s13 }
   0x5   :  { %p483_p1 = scmp.lt.u32.totalorder %s479_s16, %s723_s0 }
   0x7   :  { %p485_p2 = pnand %p483_p1, %p480_p0 }
   0x9   :  { %488 = shalt.err (!%p485_p2)
}
   0xa   :  { %s489_s21 = scalar_lea.vmem %s23_s13, 256  ;;  %p494_p4 = scmp.lt.s32.totalorder %s23_s13, %s23_s13 }
   0xb   :  { %p490_p3 = scmp.ne.s32.totalorder %s23_s13, %s489_s21  ;;  %p495_p5 = scmp.lt.s32.totalorder %s489_s21, %s489_s21 }
   0xd   :  { %p496_p6 = por %p495_p5, %p494_p4 }
   0xf   :  { %p497_p7 = pnand %p496_p6, %p490_p3 }
  0x11   :  { %500 = shalt.err (!%p497_p7)
}
  0x12   :  { %s576_s22 = smov 128   ;;  %s577_s23 = smov 8  }
  0x13   :  { %28 = dma.hbm_to_vmem [thread:$0]  %s723_s0, 256, %s23_s13, [#allocation4], %s576_s22, %s576_s22, %s577_s23  }
  0x14   :  { %s578_s26 = smov [#allocation6]   ;;  %s501_s30 = scalar_lea.hbm %s724_s1, 64 }
  0x15   :  { %s38_s27 = sshll.u32 %s578_s26, 4  ;;  %p502_p8 = scmp.ne.s32.totalorder %s724_s1, %s501_s30  ;;  %s39_s27 = int_to_ptr.vmem [resolvable:$true] %s38_s27 }
  0x16   :  { %p505_p9 = scmp.lt.u32.totalorder %s501_s30, %s724_s1 }
  0x18   :  { %p507_p10 = pnand %p505_p9, %p502_p8 }
  0x1a   :  { %510 = shalt.err (!%p507_p10)
}
  0x1b   :  { %s511_s8 = scalar_lea.vmem %s39_s27, 64  ;;  %p516_p12 = scmp.lt.s32.totalorder %s39_s27, %s39_s27 }
  0x1c   :  { %p512_p11 = scmp.ne.s32.totalorder %s39_s27, %s511_s8  ;;  %p517_p13 = scmp.lt.s32.totalorder %s511_s8, %s511_s8 }
  0x1e   :  { %p518_p0 = por %p517_p13, %p516_p12 }
  0x20   :  { %p519_p1 = pnand %p518_p0, %p512_p11 }
  0x22   :  { %522 = shalt.err (!%p519_p1)
}
  0x23   :  { %s579_s0 = smov 32   ;;  %s580_s9 = smov 2  }
  0x24   :  { %44 = dma.hbm_to_vmem [thread:$0]  %s724_s1, 64, %s39_s27, [#allocation7], %s579_s0, %s579_s0, %s580_s9  }
  0x25   :  { %567 = dma.done.wait [#allocation4], 256  }
  0x26   :  { %568 = vsyncadd [#allocation4], 4294967040 }
  0x27   :  { %569 = dma.done.wait [#allocation7], 64  }
  0x28   :  { %570 = vsyncadd [#allocation7], 4294967232  ;;  %v581_v0 = vmov 0.0   ;;  %vm72_vm0 = vcmask 1043456   ;;  %v60_v1 = vld [vmem:[#allocation3] sm:$0xff]  ;;  %v61_v2 = vld [vmem:[#allocation3 + $0x8] sm:$0xff]  ;;  %v157_v26 = vlaneseq }
  0x29   :  { %59 = vst [vmem:[#allocation2] sm:$0xf] %v581_v0  ;;  %v68_v3 = vcombine.high %v60_v1, %v60_v1  ;;  %v69_v4 = vcombine.high %v61_v2, %v61_v2  ;;  %v73_v5 = vsel %vm72_vm0, %v60_v1, -inf  ;;  %v87_v7 = vsel %vm72_vm0, %v61_v2, -inf  ;;  %v640_v40 = vld [vmem:[#allocation6] sm:$0x3] }
  0x2a   :  { %v74_v6 = vrot.slane %v73_v5, 4  ;;  %v88_v9 = vrot.slane %v87_v7, 4  ;;  %v635_v34 = vshrl.u32 %v157_v26, 7  ;;  %v645_v42 = vld [vmem:[#allocation6 + $0x2] sm:$0x3]  ;;  %vm64_vm5 = vcmp.ne.s32.totalorder %v640_v40, 255 }
  0x2b   :  { %v80_v8 = vsel %vm72_vm0, %v68_v3, -inf  ;;  %v94_v10 = vsel %vm72_vm0, %v69_v4, -inf  ;;  %vm65_vm6 = vcmp.ne.s32.totalorder %v645_v42, 255  ;;  %vm327_vm7 = vcmask 1040384   ;;  %s584_s1 = smov [#allocation8]   ;;  %s585_s14 = smov [#allocation9]  }
  0x2c   :  { %v75_v11 = vmax.f32 %v73_v5, %v74_v6  ;;  %v81_v12 = vrot.slane %v80_v8, 4  ;;  %v95_v13 = vrot.slane %v94_v10, 4  ;;  %v89_v14 = vmax.f32 %v87_v7, %v88_v9  ;;  %s416_s12 = sshll.u32 %s584_s1, 4  ;;  %s426_s15 = sshll.u32 %s585_s14, 4  ;;  %s417_s12 = int_to_ptr.vmem [resolvable:$true] %s416_s12  ;;  %s427_s15 = int_to_ptr.vmem [resolvable:$true] %s426_s15 }
  0x2d   :  { %v638_v39 = vsub.s32 0, %v635_v34  ;;  %v643_v41 = vsub.s32 1, %v635_v34  ;;  %vm332_vm8 = vcmask 1041408   ;;  %vm381_vm9 = vcmask 0   ;;  %s523_s16 = scalar_lea.vmem %s417_s12, 16  ;;  %s527_s17 = scalar_lea.vmem %s417_s12, 32 }
  0x2e   :  { %v76_v15 = vrot.slane %v75_v11, 2  ;;  %v82_v16 = vmax.f32 %v80_v8, %v81_v12  ;;  %v96_v17 = vmax.f32 %v94_v10, %v95_v13  ;;  %v90_v18 = vrot.slane %v89_v14, 2  ;;  %p524_p2 = scmp.ne.s32.totalorder %s417_s12, %s523_s16  ;;  %p528_p3 = scmp.lt.s32.totalorder %s417_s12, %s417_s12 }
  0x2f   :  { %v162_v45 = vrot.slane %v640_v40, %v638_v39  ;;  %v170_v46 = vrot.slane %v645_v42, %v638_v39  ;;  %v166_v47 = vrot.slane %v640_v40, %v643_v41  ;;  %v174_v48 = vrot.slane %v645_v42, %v643_v41  ;;  %p529_p4 = scmp.lt.s32.totalorder %s527_s17, %s523_s16 }
  0x30   :  { %v77_v19 = vmax.f32 %v75_v11, %v76_v15  ;;  %v83_v20 = vrot.slane %v82_v16, 2  ;;  %v97_v21 = vrot.slane %v96_v17, 2  ;;  %v91_v22 = vmax.f32 %v89_v14, %v90_v18 }
  0x31   :  { %vm175_vm1 = vcmp.eq.s32.totalorder %v635_v34, %v162_v45  ;;  %vm177_vm2 = vcmp.eq.s32.totalorder %v635_v34, %v170_v46  ;;  %vm176_vm3 = vcmp.eq.s32.totalorder %v635_v34, %v166_v47  ;;  %vm178_vm4 = vcmp.eq.s32.totalorder %v635_v34, %v174_v48  ;;  %p530_p5 = por %p529_p4, %p528_p3 }
  0x32   :  { %v78_v23 = vrot.slane %v77_v19, 1  ;;  %v84_v24 = vmax.f32 %v82_v16, %v83_v20  ;;  %v98_v25 = vmax.f32 %v96_v17, %v97_v21  ;;  %v92_v27 = vrot.slane %v91_v22, 1 }
  0x33   :  { %p531_p6 = pnand %p530_p5, %p524_p2 }
  0x34   :  { %v79_v28 = vmax.f32 %v77_v19, %v78_v23  ;;  %v85_v29 = vrot.slane %v84_v24, 1  ;;  %v99_v30 = vrot.slane %v98_v25, 1  ;;  %v93_v31 = vmax.f32 %v91_v22, %v92_v27 }
  0x36   :  { %v86_v32 = vmax.f32 %v84_v24, %v85_v29  ;;  %v100_v33 = vmax.f32 %v98_v25, %v99_v30 }
  0x38   :  { %v105_v35 = vcombine.low %v79_v28, %v86_v32  ;;  %v106_v36 = vcombine.low %v93_v31, %v100_v33 }
  0x3a   :  { %v109_v37 = vsub.f32 %v60_v1, %v105_v35  ;;  %v110_v38 = vsub.f32 %v61_v2, %v106_v36 }
  0x3c   :  { %v111_v43 = vmul.f32 1.442695, %v109_v37  ;;  %v113_v44 = vmul.f32 1.442695, %v110_v38  ;;  %v181_v49 = vcombine.high %v109_v37, %v109_v37  ;;  %v182_v50 = vcombine.high %v110_v38, %v110_v38 }
  0x3d   :  { %v185_v51 = vsel %vm175_vm1, %v109_v37, 0.0  ;;  %v187_v52 = vsel %vm177_vm2, %v110_v38, 0.0 }
  0x3e   :  { %459 = vpow2.f32 %v111_v43  ;;  %v186_v53 = vsel %vm176_vm3, %v181_v49, 0.0  ;;  %v188_v55 = vsel %vm178_vm4, %v182_v50, 0.0  ;;  %v189_v56 = vsel %vm72_vm0, %v185_v51, 0.0 }
  0x3f   :  { %461 = vpow2.f32 %v113_v44  ;;  %v203_v60 = vsel %vm72_vm0, %v187_v52, 0.0  ;;  %v196_v1 = vsel %vm72_vm0, %v186_v53, 0.0  ;;  %v190_v4 = vrot.slane %v189_v56, 4 }
  0x40   :  { %v210_v5 = vsel %vm72_vm0, %v188_v55, 0.0  ;;  %v204_v9 = vrot.slane %v203_v60, 4  ;;  %v197_v12 = vrot.slane %v196_v1, 4 }
  0x41   :  { %v211_v15 = vrot.slane %v210_v5, 4  ;;  %v191_v18 = vadd.f32 %v190_v4, %v189_v56 }
  0x42   :  { %v205_v21 = vadd.f32 %v204_v9, %v203_v60  ;;  %v198_v24 = vadd.f32 %v197_v12, %v196_v1 }
  0x43   :  { %v212_v27 = vadd.f32 %v211_v15, %v210_v5  ;;  %v192_v30 = vrot.slane %v191_v18, 2 }
  0x44   :  { %v206_v33 = vrot.slane %v205_v21, 2  ;;  %v199_v37 = vrot.slane %v198_v24, 2 }
  0x45   :  { %v213_v43 = vrot.slane %v212_v27, 2  ;;  %v193_v45 = vadd.f32 %v192_v30, %v191_v18 }
  0x46   :  { %v207_v46 = vadd.f32 %v206_v33, %v205_v21  ;;  %v200_v47 = vadd.f32 %v199_v37, %v198_v24  ;;  %v440_v33 = vsel %vm64_vm5, 1.0, %v581_v0 }
  0x47   :  { %v214_v48 = vadd.f32 %v213_v43, %v212_v27  ;;  %v194_v49 = vrot.slane %v193_v45, 1  ;;  %v314_v40 = vrot.slane %v440_v33, %v643_v41 }
  0x48   :  { %v460_v54 = vpop.eup %459  ;;  %v208_v50 = vrot.slane %v207_v46, 1  ;;  %v201_v51 = vrot.slane %v200_v47, 1 }
  0x49   :  { %v462_v57 = vpop.eup %461  ;;  %v117_v58 = vcombine.high %v460_v54, %v460_v54  ;;  %v121_v59 = vsel %vm72_vm0, %v460_v54, 0.0  ;;  %v215_v52 = vrot.slane %v214_v48, 1  ;;  %v195_v53 = vadd.f32 %v194_v49, %v193_v45 }
  0x4a   :  { %v118_v61 = vcombine.high %v462_v57, %v462_v57  ;;  %v122_v62 = vrot.slane %v121_v59, 4  ;;  %v135_v63 = vsel %vm72_vm0, %v462_v57, 0.0  ;;  %v209_v55 = vadd.f32 %v208_v50, %v207_v46 }
  0x4b   :  { %v128_v2 = vsel %vm72_vm0, %v117_v58, 0.0  ;;  %v136_v3 = vrot.slane %v135_v63, 4  ;;  %v202_v58 = vadd.f32 %v201_v51, %v200_v47  ;;  %v310_v45 = vrot.slane %v440_v33, %v638_v39 }
  0x4c   :  { %v123_v6 = vadd.f32 %v122_v62, %v121_v59  ;;  %v129_v7 = vrot.slane %v128_v2, 4  ;;  %v142_v8 = vsel %vm72_vm0, %v118_v61, 0.0  ;;  %v216_v61 = vadd.f32 %v215_v52, %v214_v48 }
  0x4d   :  { %v137_v10 = vadd.f32 %v136_v3, %v135_v63  ;;  %v143_v11 = vrot.slane %v142_v8, 4 }
  0x4e   :  { %v124_v13 = vrot.slane %v123_v6, 2  ;;  %v130_v14 = vadd.f32 %v129_v7, %v128_v2 }
  0x4f   :  { %v138_v16 = vrot.slane %v137_v10, 2  ;;  %v144_v17 = vadd.f32 %v143_v11, %v142_v8 }
  0x50   :  { %v125_v19 = vadd.f32 %v124_v13, %v123_v6  ;;  %v131_v20 = vrot.slane %v130_v14, 2 }
  0x51   :  { %v139_v22 = vadd.f32 %v138_v16, %v137_v10  ;;  %v145_v23 = vrot.slane %v144_v17, 2  ;;  %v582_v10 = vmov 1966171168  }
  0x52   :  { %v126_v25 = vrot.slane %v125_v19, 1  ;;  %v132_v26 = vadd.f32 %v131_v20, %v130_v14  ;;  %v247_v11 = vunpack.c.l.s4 %v582_v10 }
  0x53   :  { %v140_v28 = vrot.slane %v139_v22, 1  ;;  %v146_v29 = vadd.f32 %v145_v23, %v144_v17 }
  0x54   :  { %v127_v31 = vadd.f32 %v126_v25, %v125_v19  ;;  %v133_v32 = vrot.slane %v132_v26, 1  ;;  %v248_v20 = vunpack.c.0.s8 %v247_v11 }
  0x55   :  { %v141_v35 = vadd.f32 %v140_v28, %v139_v22  ;;  %v147_v36 = vrot.slane %v146_v29, 1 }
  0x56   :  { %v134_v38 = vadd.f32 %v133_v32, %v132_v26  ;;  %463 = vlog2.f32 %v127_v31  ;;  %v251_v28 = vsub.s32 %v248_v20, %v635_v34 }
  0x57   :  { %v148_v44 = vadd.f32 %v147_v36, %v146_v29  ;;  %465 = vlog2.f32 %v141_v35  ;;  %v441_v36 = vsel %vm65_vm6, 1.0, %v581_v0 }
  0x58   :  { %467 = vlog2.f32 %v134_v38  ;;  %v583_v38 = vmov 1983009808   ;;  %v318_v47 = vrot.slane %v441_v36, %v638_v39  ;;  %v322_v48 = vrot.slane %v441_v36, %v643_v41 }
  0x59   :  { %469 = vlog2.f32 %v148_v44  ;;  %v344_v43 = vunpack.c.l.s4 %v583_v38 }
  0x60   :  { %v464_v54 = vpop.eup %463 }
  0x61   :  { %v466_v56 = vpop.eup %465  ;;  %v150_v57 = vmul.f32 0.6931472, %v464_v54 }
  0x62   :  { %v468_v59 = vpop.eup %467  ;;  %v154_v60 = vmul.f32 0.6931472, %v466_v56 }
  0x63   :  { %v470_v62 = vpop.eup %469  ;;  %v152_v63 = vmul.f32 0.6931472, %v468_v59  ;;  %v217_v1 = vsub.f32 %v195_v53, %v150_v57  ;;  %v345_v53 = vunpack.c.0.s8 %v344_v43 }
  0x64   :  { %v156_v2 = vmul.f32 0.6931472, %v470_v62  ;;  %v219_v3 = vsub.f32 %v209_v55, %v154_v60 }
  0x65   :  { %v218_v4 = vsub.f32 %v202_v58, %v152_v63  ;;  %v221_v5 = vmul.f32 1.442695, %v217_v1  ;;  %v348_v63 = vsub.s32 %v345_v53, %v635_v34 }
  0x66   :  { %v220_v6 = vsub.f32 %v216_v61, %v156_v2  ;;  %v225_v7 = vmul.f32 1.442695, %v219_v3  ;;  %v339_v2 = vld [vmem:[#allocation2] sm:$0xf] }
  0x67   :  { %471 = vpow2.f32 %v221_v5  ;;  %v223_v8 = vmul.f32 1.442695, %v218_v4 }
  0x68   :  { %473 = vpow2.f32 %v225_v7  ;;  %v227_v9 = vmul.f32 1.442695, %v220_v6 }
  0x69   :  { %475 = vpow2.f32 %v223_v8 }
  0x6a   :  { %477 = vpow2.f32 %v227_v9 }
  0x71   :  { %v472_v12 = vpop.eup %471 }
  0x72   :  { %v474_v13 = vpop.eup %473  ;;  %v229_v14 = vsub.f32 1.0, %v472_v12 }
  0x73   :  { %v476_v15 = vpop.eup %475  ;;  %v231_v16 = vsub.f32 1.0, %v474_v13 }
  0x74   :  { %v478_v17 = vpop.eup %477  ;;  %v230_v18 = vsub.f32 1.0, %v476_v15  ;;  %v233_v19 = vmul.f32 %v229_v14, %v229_v14 }
  0x75   :  { %v232_v21 = vsub.f32 1.0, %v478_v17  ;;  %v235_v22 = vmul.f32 %v231_v16, %v231_v16 }
  0x76   :  { %v234_v23 = vmul.f32 %v230_v18, %v230_v18  ;;  %v237_v24 = vmul.f32 %v233_v19, %v217_v1 }
  0x77   :  { %v236_v25 = vmul.f32 %v232_v21, %v232_v21  ;;  %v239_v26 = vmul.f32 %v235_v22, %v219_v3 }
  0x78   :  { %v238_v27 = vmul.f32 %v234_v23, %v218_v4 }
  0x79   :  { %v240_v29 = vmul.f32 %v236_v25, %v220_v6 }
  0x7a   :  { %v245_v30 = vcombine.low %v237_v24, %v238_v27 }
  0x7b   :  { %v260_v31 = vcombine.low %v239_v26, %v240_v29 }
  0x7c   :  { %v252_v32 = vrot.slane %v245_v30, %v251_v28 }
  0x7d   :  { %v267_v35 = vrot.slane %v260_v31, %v251_v28 }
  0x7e   :  { %v259_v37 = vrot.slane %v252_v32, %v251_v28 }
  0x7f   :  { %v274_v44 = vrot.slane %v267_v35, %v251_v28 }
  0x80   :  { %v277_v46 = vsel %vm64_vm5, %v259_v37, 0.0 }
  0x81   :  { %v278_v49 = vsel %vm65_vm6, %v274_v44, 0.0  ;;  %v288_v50 = vrot.slane %v277_v46, %v638_v39  ;;  %v292_v0 = vrot.slane %v277_v46, %v643_v41 }
  0x82   :  { %v296_v51 = vrot.slane %v278_v49, %v638_v39  ;;  %v300_v52 = vrot.slane %v278_v49, %v643_v41 }
  0x83   :  { %v328_v54 = vsel %vm327_vm7, %v288_v50, %v310_v45  ;;  %v329_v55 = vsel %vm327_vm7, %v292_v0, %v314_v40 }
  0x84   :  { %v330_v56 = vsel %vm327_vm7, %v296_v51, %v318_v47  ;;  %v331_v57 = vsel %vm327_vm7, %v300_v52, %v322_v48  ;;  %v333_v42 = vsel %vm332_vm8, %v328_v54, 0.0  ;;  %v336_v58 = vsel %vm332_vm8, %v329_v55, 0.0 }
  0x85   :  { %v334_v59 = vsel %vm332_vm8, %v330_v56, 0.0  ;;  %v337_v60 = vsel %vm332_vm8, %v331_v57, 0.0 }
  0x86   :  { %v335_v61 = vadd.f32 %v334_v59, %v333_v42  ;;  %v338_v62 = vadd.f32 %v337_v60, %v336_v58 }
  0x88   :  { %v342_v1 = vcombine.low %v335_v61, %v338_v62 }
  0x8a   :  { %v349_v3 = vrot.slane %v342_v1, %v348_v63 }
  0x8c   :  { %v351_v4 = vadd.f32 %v349_v3, %v339_v2 }
  0x8e   :  { %352 = vst [vmem:[#allocation2] sm:$0xf] %v351_v4 }
  0x95   :  { %v356_v5 = vld [vmem:[#allocation2] ss:$2 sm:$0x3]  ;;  %v384_v6 = vld [vmem:[#allocation2 + $0x1] ss:$2 sm:$0x3] }
  0x96   :  { %v361_v7 = vrot.slane %v356_v5, %v638_v39  ;;  %v365_v8 = vrot.slane %v356_v5, %v643_v41  ;;  %v389_v9 = vrot.slane %v384_v6, %v638_v39  ;;  %v393_v10 = vrot.slane %v384_v6, %v643_v41 }
  0x98   :  { %v368_v11 = vsel %vm327_vm7, %v361_v7, 0.0  ;;  %v369_v12 = vsel %vm327_vm7, %v365_v8, 0.0  ;;  %v396_v34 = vsel %vm327_vm7, %v389_v9, 0.0  ;;  %v397_v13 = vsel %vm327_vm7, %v393_v10, 0.0 }
  0x99   :  { %v370_v14 = vadd.f32 %v369_v12, %v368_v11  ;;  %v398_v15 = vadd.f32 %v397_v13, %v396_v34 }
  0x9b   :  { %371 = vadd.xlane.f32.xlu0 %v370_v14 }
  0x9f   :  { %399 = vadd.xlane.f32.xlu0 %v398_v15 }
 0x128   :  { %v372_v16 = vpop.xlane.xlu0 %371 }
 0x129   :  { %v373_v17 = vrot.slane %v372_v16, 4 }
 0x12b   :  { %v374_v18 = vadd.f32 %v373_v17, %v372_v16 }
 0x12c   :  { %v400_v19 = vpop.xlane.xlu0 %399 }
 0x12d   :  { %v375_v20 = vrot.slane %v374_v18, 2  ;;  %v401_v39 = vrot.slane %v400_v19, 4 }
 0x12f   :  { %v402_v21 = vadd.f32 %v401_v39, %v400_v19  ;;  %v376_v41 = vadd.f32 %v375_v20, %v374_v18 }
 0x131   :  { %v403_v22 = vrot.slane %v402_v21, 2  ;;  %v377_v23 = vrot.slane %v376_v41, 1 }
 0x133   :  { %v404_v24 = vadd.f32 %v403_v22, %v402_v21  ;;  %v378_v25 = vadd.f32 %v377_v23, %v376_v41 }
 0x135   :  { %442 = vpush %v378_v25  ;;  %v405_v26 = vrot.slane %v404_v24, 1 }
 0x137   :  { %v406_v27 = vadd.f32 %v405_v26, %v404_v24 }
 0x139   :  { %444 = vpush %v406_v27 }
 0x166   :  { %s443_s13 = spop %442 }
 0x167   :  { %v380_v28 = vstv %s443_s13 }
 0x168   :  { %382 = vst.msk [vmem:[#allocation8] sm:$0x1] %vm381_vm9, %v380_v28 }
 0x169   :  { %534 = shalt.err (!%p531_p6)
}
 0x16a   :  { %s535_s20 = scalar_lea.hbm %s725_s2, 16 }
 0x16b   :  { %p536_p7 = scmp.ne.s32.totalorder %s725_s2, %s535_s20  ;;  %p539_p8 = scmp.lt.u32.totalorder %s535_s20, %s725_s2 }
 0x16d   :  { %p541_p9 = pnand %p539_p8, %p536_p7 }
 0x16f   :  { %544 = shalt.err (!%p541_p9)
}
 0x170   :  { %419 = dma.vmem_to_hbm [thread:$0]  %s417_s12, 16, %s725_s2, [#allocation5]  }
 0x171   :  { %s445_s27 = spop %444  ;;  %s545_s28 = scalar_lea.vmem %s427_s15, 16 }
 0x172   :  { %v408_v29 = vstv %s445_s27  ;;  %p546_p10 = scmp.ne.s32.totalorder %s427_s15, %s545_s28  ;;  %s549_s29 = scalar_lea.vmem %s427_s15, 32 }
 0x173   :  { %409 = vst.msk [vmem:[#allocation9] sm:$0x1] %vm381_vm9, %v408_v29  ;;  %p550_p11 = scmp.lt.s32.totalorder %s427_s15, %s427_s15  ;;  %p551_p12 = scmp.lt.s32.totalorder %s549_s29, %s545_s28 }
 0x175   :  { %p552_p13 = por %p551_p12, %p550_p11 }
 0x177   :  { %p553_p0 = pnand %p552_p13, %p546_p10 }
 0x179   :  { %556 = shalt.err (!%p553_p0)
}
 0x17a   :  { %s557_s5 = scalar_lea.hbm %s726_s3, 16 }
 0x17b   :  { %p558_p1 = scmp.ne.s32.totalorder %s726_s3, %s557_s5  ;;  %p561_p2 = scmp.lt.u32.totalorder %s557_s5, %s726_s3 }
 0x17d   :  { %p563_p3 = pnand %p561_p2, %p558_p1 }
 0x17f   :  { %566 = shalt.err (!%p563_p3)
}
 0x180   :  { %429 = dma.vmem_to_hbm [thread:$0]  %s427_s15, 16, %s726_s3, [#allocation10]  }
 0x181   :  { %571 = dma.done.wait [#allocation5], 16  }
 0x182   :  { %572 = vsyncadd [#allocation5], 4294967280 }
 0x183   :  { %573 = dma.done.wait [#allocation10], 16  }
 0x184   :  { %574 = vsyncadd [#allocation10], 4294967280 }
 0x185   :  { %436 = vsyncpa [#allocation4], 1 }
 0x186   :  { %437 = vsyncpa [#allocation7], 1 }
 0x187   :  { %438 = vsyncpa [#allocation5], 1 }
 0x188   :  { %439 = vsyncpa [#allocation10], 1 }

</bundles_post_ra>
